<compile_context>
chip_gen: v7x
topology: tpu7x:2x2x1
jax: 0.10.0
libtpu: 0.0.40
codegen_flags: <defaults>
</compile_context>

<pallas_src>
import jax
import jax.numpy as jnp
from jax.experimental import pallas as pl
from jax.experimental.pallas import tpu as pltpu


def _aggregate_kernel(x_ref, w1_ref, b1_ref, w2_ref, b2_ref, w3_ref, b3_ref,
                      o_ref):
    # x_ref block: (TM, E) rows of the flattened input.
    x = x_ref[...]

    # Linear1 + ReLU  (dropout == identity in eval mode)
    h = jnp.dot(x, w1_ref[...], preferred_element_type=jnp.float32)
    h = jnp.maximum(h + b1_ref[...], 0.0)                      # (TM, H1)

    # Linear2  (dropout == identity in eval mode; no ReLU in the reference)
    h = jnp.dot(h, w2_ref[...], preferred_element_type=jnp.float32)
    h = h + b2_ref[...]                                        # (TM, H2)

    # Linear3 + sigmoid
    y = jnp.dot(h, w3_ref[...], preferred_element_type=jnp.float32)
    y = y + b3_ref[...]                                        # (TM, L)
    y = 1.0 / (1.0 + jnp.exp(-y))                              # EUP exp + divide

    o_ref[...] = y.astype(o_ref.dtype)


def aggregate_forward_net(x, w1_t, b1, w2_t, b2, w3_t, b3, *, tm=128):
    """x: (..., E) float32. Weights pre-transposed: (E,H1), (H1,H2), (H2,L).
    Biases as (1,H1), (1,H2), (1,L).  Returns flattened (M*L,) float32."""
    E = x.shape[-1]
    x2 = x.reshape(-1, E)
    M = x2.shape[0]
    H1 = w1_t.shape[1]
    H2 = w2_t.shape[1]
    L = w3_t.shape[1]

    # Row tile: whole problem in one grid step when small; otherwise tm-row
    # tiles (pad M up so the grid divides evenly, slice the padding off after).
    if M <= tm:
        tm_eff, m_pad = M, M
    else:
        tm_eff = tm
        m_pad = pl.cdiv(M, tm) * tm
    if m_pad != M:
        x2 = jnp.pad(x2, ((0, m_pad - M), (0, 0)))

    out = pl.pallas_call(
        _aggregate_kernel,
        out_shape=jax.ShapeDtypeStruct((m_pad, L), x.dtype),
        grid_spec=pltpu.PrefetchScalarGridSpec(
            num_scalar_prefetch=0,
            grid=(m_pad // tm_eff,),
            in_specs=[
                pl.BlockSpec((tm_eff, E), lambda i: (i, 0)),    # x rows
                pl.BlockSpec((E, H1), lambda i: (0, 0)),        # W1^T (resident)
                pl.BlockSpec((1, H1), lambda i: (0, 0)),        # b1
                pl.BlockSpec((H1, H2), lambda i: (0, 0)),       # W2^T (resident)
                pl.BlockSpec((1, H2), lambda i: (0, 0)),        # b2
                pl.BlockSpec((H2, L), lambda i: (0, 0)),        # W3^T (resident)
                pl.BlockSpec((1, L), lambda i: (0, 0)),         # b3
            ],
            out_specs=pl.BlockSpec((tm_eff, L), lambda i: (i, 0)),
        ),
        compiler_params=pltpu.CompilerParams(
            dimension_semantics=("parallel",)),
    )(x2, w1_t, b1, w2_t, b2, w3_t, b3)

    return out[:M].reshape(-1)


def _reference(x, w1_t, b1, w2_t, b2, w3_t, b3):
    x2 = x.reshape(-1, x.shape[-1])
    h = jnp.maximum(x2 @ w1_t + b1, 0.0)
    h = h @ w2_t + b2
    y = 1.0 / (1.0 + jnp.exp(-(h @ w3_t + b3)))
    return y.reshape(-1)


if __name__ == "__main__":
    # Small but lane/sublane-friendly shapes implied by the module.
    B = 256          # rows after flattening (gives a 2-step parallel grid)
    E = 64           # agg_emb_size
    H1 = 128         # hidden_size1
    H2 = 64          # hidden_size2
    L = 4            # label_size

    key = jax.random.PRNGKey(0)
    ks = jax.random.split(key, 7)

    # Deterministic parameter init (PyTorch-Linear-style uniform ranges).
    lim1 = 1.0 / jnp.sqrt(E)
    w1 = jax.random.uniform(ks[0], (H1, E), jnp.float32, -lim1, lim1)   # torch layout
    b1 = jax.random.uniform(ks[1], (H1,), jnp.float32, -lim1, lim1)
    lim2 = 1.0 / jnp.sqrt(H1)
    w2 = jax.random.uniform(ks[2], (H2, H1), jnp.float32, -lim2, lim2)
    b2 = jax.random.uniform(ks[3], (H2,), jnp.float32, -lim2, lim2)
    lim3 = 1.0 / jnp.sqrt(H2)
    w3 = jax.random.uniform(ks[4], (L, H2), jnp.float32, -lim3, lim3)
    b3 = jax.random.uniform(ks[5], (L,), jnp.float32, -lim3, lim3)

    # Input (B, E): aggregated compare-network features.
    x = jax.random.normal(ks[6], (B, E), jnp.float32)

    # Glue: pre-transpose weights, reshape biases to (1, .) lane vectors.
    w1_t, w2_t, w3_t = w1.T, w2.T, w3.T
    b1_r, b2_r, b3_r = b1.reshape(1, H1), b2.reshape(1, H2), b3.reshape(1, L)

    out = aggregate_forward_net(x, w1_t, b1_r, w2_t, b2_r, w3_t, b3_r, tm=128)
    out = jax.block_until_ready(out)

    ref = _reference(x, w1_t, b1_r, w2_t, b2_r, w3_t, b3_r)
    assert out.shape == (B * L,)
    assert jnp.allclose(out, ref, atol=1e-5, rtol=1e-5), "mismatch vs reference"

    print("KERNEL_OK")
</pallas_src>

<mosaic_0001>
module attributes {stable_mosaic.version = 11 : i64} {
  func.func @_aggregate_kernel(%arg0: i32, %arg1: memref<128x64xf32, #tpu.memory_space<vmem>>, %arg2: memref<64x128xf32, #tpu.memory_space<vmem>>, %arg3: memref<1x128xf32, #tpu.memory_space<vmem>>, %arg4: memref<128x64xf32, #tpu.memory_space<vmem>>, %arg5: memref<1x64xf32, #tpu.memory_space<vmem>>, %arg6: memref<64x4xf32, #tpu.memory_space<vmem>>, %arg7: memref<1x4xf32, #tpu.memory_space<vmem>>, %arg8: memref<128x4xf32, #tpu.memory_space<vmem>>) attributes {dimension_semantics = [#tpu.dimension_semantics<parallel>], iteration_bounds = array<i64: 2>, scalar_prefetch = 0 : i64, scratch_operands = 0 : i64, tpu.core_type = #tpu.core_type<tc>, window_params = [{transform_indices = @transform_0, window_bounds = array<i64: 128, 64>}, {pipeline_mode = #tpu.pipeline_mode<synchronous>, transform_indices = @transform_1, window_bounds = array<i64: 64, 128>}, {pipeline_mode = #tpu.pipeline_mode<synchronous>, transform_indices = @transform_2, window_bounds = array<i64: 1, 128>}, {pipeline_mode = #tpu.pipeline_mode<synchronous>, transform_indices = @transform_3, window_bounds = array<i64: 128, 64>}, {pipeline_mode = #tpu.pipeline_mode<synchronous>, transform_indices = @transform_4, window_bounds = array<i64: 1, 64>}, {pipeline_mode = #tpu.pipeline_mode<synchronous>, transform_indices = @transform_5, window_bounds = array<i64: 64, 4>}, {pipeline_mode = #tpu.pipeline_mode<synchronous>, transform_indices = @transform_6, window_bounds = array<i64: 1, 4>}, {transform_indices = @transform_7, window_bounds = array<i64: 128, 4>}]} {
    %c0 = arith.constant 0 : index
    %c0_0 = arith.constant 0 : index
    %0 = vector.load %arg1[%c0, %c0_0] : memref<128x64xf32, #tpu.memory_space<vmem>>, vector<128x64xf32>
    %c0_1 = arith.constant 0 : index
    %c0_2 = arith.constant 0 : index
    %1 = vector.load %arg2[%c0_1, %c0_2] : memref<64x128xf32, #tpu.memory_space<vmem>>, vector<64x128xf32>
    %cst = arith.constant dense<0.000000e+00> : vector<128x128xf32>
    %2 = tpu.matmul %0, %1, %cst {dimension_numbers = #tpu.dot_dimension_numbers<[1], [0], [0], [1], [0, 0, 1, 1], [], []>} : vector<128x64xf32>, vector<64x128xf32>, vector<128x128xf32> -> vector<128x128xf32>
    %c0_3 = arith.constant 0 : index
    %c0_4 = arith.constant 0 : index
    %3 = vector.load %arg3[%c0_3, %c0_4] : memref<1x128xf32, #tpu.memory_space<vmem>>, vector<1x128xf32>
    %4 = vector.broadcast %3 : vector<1x128xf32> to vector<128x128xf32>
    %5 = arith.addf %2, %4 : vector<128x128xf32>
    %cst_5 = arith.constant 0.000000e+00 : f32
    %6 = vector.broadcast %cst_5 : f32 to vector<128x128xf32>
    %7 = arith.maximumf %5, %6 : vector<128x128xf32>
    %c0_6 = arith.constant 0 : index
    %c0_7 = arith.constant 0 : index
    %8 = vector.load %arg4[%c0_6, %c0_7] : memref<128x64xf32, #tpu.memory_space<vmem>>, vector<128x64xf32>
    %cst_8 = arith.constant dense<0.000000e+00> : vector<128x64xf32>
    %9 = tpu.matmul %7, %8, %cst_8 {dimension_numbers = #tpu.dot_dimension_numbers<[1], [0], [0], [1], [0, 0, 1, 1], [], []>} : vector<128x128xf32>, vector<128x64xf32>, vector<128x64xf32> -> vector<128x64xf32>
    %c0_9 = arith.constant 0 : index
    %c0_10 = arith.constant 0 : index
    %10 = vector.load %arg5[%c0_9, %c0_10] : memref<1x64xf32, #tpu.memory_space<vmem>>, vector<1x64xf32>
    %11 = vector.broadcast %10 : vector<1x64xf32> to vector<128x64xf32>
    %12 = arith.addf %9, %11 : vector<128x64xf32>
    %c0_11 = arith.constant 0 : index
    %c0_12 = arith.constant 0 : index
    %13 = vector.load %arg6[%c0_11, %c0_12] : memref<64x4xf32, #tpu.memory_space<vmem>>, vector<64x4xf32>
    %cst_13 = arith.constant dense<0.000000e+00> : vector<128x4xf32>
    %14 = tpu.matmul %12, %13, %cst_13 {dimension_numbers = #tpu.dot_dimension_numbers<[1], [0], [0], [1], [0, 0, 1, 1], [], []>} : vector<128x64xf32>, vector<64x4xf32>, vector<128x4xf32> -> vector<128x4xf32>
    %c0_14 = arith.constant 0 : index
    %c0_15 = arith.constant 0 : index
    %15 = vector.load %arg7[%c0_14, %c0_15] : memref<1x4xf32, #tpu.memory_space<vmem>>, vector<1x4xf32>
    %16 = vector.broadcast %15 : vector<1x4xf32> to vector<128x4xf32>
    %17 = arith.addf %14, %16 : vector<128x4xf32>
    %cst_16 = arith.constant 0.000000e+00 : f32
    %18 = vector.broadcast %cst_16 : f32 to vector<128x4xf32>
    %19 = arith.subf %18, %17 : vector<128x4xf32>
    %20 = math.exp %19 : vector<128x4xf32>
    %cst_17 = arith.constant 1.000000e+00 : f32
    %21 = vector.broadcast %cst_17 : f32 to vector<128x4xf32>
    %22 = arith.addf %21, %20 : vector<128x4xf32>
    %cst_18 = arith.constant 1.000000e+00 : f32
    %23 = vector.broadcast %cst_18 : f32 to vector<128x4xf32>
    %24 = arith.divf %23, %22 : vector<128x4xf32>
    %c0_19 = arith.constant 0 : index
    %c0_20 = arith.constant 0 : index
    %25 = vector.load %arg8[%c0_19, %c0_20] : memref<128x4xf32, #tpu.memory_space<vmem>>, vector<128x4xf32>
    tpu.vector_store %arg8[%c0_19, %c0_20], %24 {strides = array<i32>} : memref<128x4xf32, #tpu.memory_space<vmem>>, vector<128x4xf32>,
    return
  }
  func.func @transform_0(%arg0: i32) -> (i32, i32) {
    %c0_i32 = arith.constant 0 : i32
    %c0_i32_0 = arith.constant 0 : i32
    return %arg0, %c0_i32 : i32, i32
  }
  func.func @transform_1(%arg0: i32) -> (i32, i32) {
    %c0_i32 = arith.constant 0 : i32
    %c0_i32_0 = arith.constant 0 : i32
    %c0_i32_1 = arith.constant 0 : i32
    return %c0_i32, %c0_i32_0 : i32, i32
  }
  func.func @transform_2(%arg0: i32) -> (i32, i32) {
    %c0_i32 = arith.constant 0 : i32
    %c0_i32_0 = arith.constant 0 : i32
    %c0_i32_1 = arith.constant 0 : i32
    return %c0_i32, %c0_i32_0 : i32, i32
  }
  func.func @transform_3(%arg0: i32) -> (i32, i32) {
    %c0_i32 = arith.constant 0 : i32
    %c0_i32_0 = arith.constant 0 : i32
    %c0_i32_1 = arith.constant 0 : i32
    return %c0_i32, %c0_i32_0 : i32, i32
  }
  func.func @transform_4(%arg0: i32) -> (i32, i32) {
    %c0_i32 = arith.constant 0 : i32
    %c0_i32_0 = arith.constant 0 : i32
    %c0_i32_1 = arith.constant 0 : i32
    return %c0_i32, %c0_i32_0 : i32, i32
  }
  func.func @transform_5(%arg0: i32) -> (i32, i32) {
    %c0_i32 = arith.constant 0 : i32
    %c0_i32_0 = arith.constant 0 : i32
    %c0_i32_1 = arith.constant 0 : i32
    return %c0_i32, %c0_i32_0 : i32, i32
  }
  func.func @transform_6(%arg0: i32) -> (i32, i32) {
    %c0_i32 = arith.constant 0 : i32
    %c0_i32_0 = arith.constant 0 : i32
    %c0_i32_1 = arith.constant 0 : i32
    return %c0_i32, %c0_i32_0 : i32, i32
  }
  func.func @transform_7(%arg0: i32) -> (i32, i32) {
    %c0_i32 = arith.constant 0 : i32
    %c0_i32_0 = arith.constant 0 : i32
    return %arg0, %c0_i32 : i32, i32
  }
}

</mosaic_0001>

<bundles_post_ra>
// kernel: tpu_custom_call.1
= control target key start
LH: loop header
LB: loop body
LE: loop exit
PB: predicated region body
PF: predicated region fallthrough
CT: control target
= control target key end

     0   :  { %s1522_s24 = smov 0   ;;  %s1771_s0 = inlined_call_operand.vmem [shape: f32[256,64], index: 0, kind: input, shape index: {}]   ;;  %s1772_s1 = inlined_call_operand.vmem [shape: f32[64,128], index: 1, kind: input, shape index: {}]   ;;  %s1773_s2 = inlined_call_operand.vmem [shape: f32[1,128], index: 2, kind: input, shape index: {}]   ;;  %s1774_s3 = inlined_call_operand.vmem [shape: f32[128,64], index: 3, kind: input, shape index: {}]   ;;  %s1775_s4 = inlined_call_operand.vmem [shape: f32[1,64], index: 4, kind: input, shape index: {}]   ;;  %s1776_s5 = inlined_call_operand.vmem [shape: f32[64,4], index: 5, kind: input, shape index: {}]   ;;  %s1777_s6 = inlined_call_operand.vmem [shape: f32[1,4], index: 6, kind: input, shape index: {}]   ;;  %s1778_s7 = inlined_call_operand.vmem [shape: f32[256,4], index: 7, kind: output, shape index: {}]  }
   0x1 LB: > { %s1068_s25 = sadd.s32 4294967295, %s1480_s24   ;;  %p1072_p0 = scmp.ge.s32.totalorder %s1480_s24, 1  ;;  %s1480_s24 = sphi %s1522_s24, %s17_s24  }
   0x2   : > { %p238_p1 = scmp.lt.s32.totalorder %s1480_s24, 3 }
   0x4   : > { %p239_p2 = pnand %p1072_p0, %p238_p1 }
   0x5   : > { %v298_v0 = vld [vmem:[%s1772_s1] sm:$0xff] (!%p239_p2)  ;;  %v299_v1 = vld [vmem:[%s1772_s1 + $0x8] sm:$0xff] (!%p239_p2)  ;;  %v300_v2 = vld [vmem:[%s1772_s1 + $0x10] sm:$0xff] (!%p239_p2)  ;;  %s1073_s9 = sshll.u32 (!%p239_p2), %s1068_s25, 4  ;;  %vm313_vm0 = vcmask (!%p239_p2), 523264   ;;  %vm995_vm1 = vcmask (!%p239_p2), 31744  }
   0x6   : > { %242 = sbr.rel (%p239_p2) target bundleno = 732 (0x2dc), region = 48  ;;  %v1330_v3 = vpack.c.bf16 (!%p239_p2), %v299_v1, %v298_v0  ;;  %v301_v4 = vld [vmem:[%s1772_s1 + $0x18] sm:$0xff] (!%p239_p2)  ;;  %p271_p3 = scmp.lt.s32.totalorder (!%p239_p2), %s1073_s9, 31  ;;  %v302_v6 = vld [vmem:[%s1772_s1 + $0x20] sm:$0xff] (!%p239_p2)  ;;  %v303_v7 = vld [vmem:[%s1772_s1 + $0x28] sm:$0xff] (!%p239_p2) }
   0x7   : > { %v1334_v5 = vpack.c.bf16 (!%p239_p2), %v301_v4, %v300_v2  ;;  %v523_v8 = vld [vmem:[%s1774_s3] sm:$0xff] (!%p239_p2)  ;;  %v524_v9 = vld [vmem:[%s1774_s3 + $0x8] sm:$0xff] (!%p239_p2)  ;;  %v525_v10 = vld [vmem:[%s1774_s3 + $0x10] sm:$0xff] (!%p239_p2)  ;;  %v1338_v13 = vpack.c.bf16 (!%p239_p2), %v303_v7, %v302_v6 }
   0x8   : > { %1331 = vmatprep.subr.bf16.mxu0 (!%p239_p2), %v1330_v3  ;;  %v526_v11 = vld [vmem:[%s1774_s3 + $0x18] sm:$0xff] (!%p239_p2)  ;;  %v1346_v12 = vpack.c.bf16 (!%p239_p2), %v524_v9, %v523_v8  ;;  %v527_v15 = vld [vmem:[%s1774_s3 + $0x20] sm:$0xff] (!%p239_p2)  ;;  %v528_v16 = vld [vmem:[%s1774_s3 + $0x28] sm:$0xff] (!%p239_p2) }
   0x9   : > { %1333 = vmatpush3.bf16.msra.mxu0 (!%p239_p2), %v1330_v3  ;;  %v1350_v14 = vpack.c.bf16 (!%p239_p2), %v526_v11, %v525_v10  ;;  %v304_v17 = vld [vmem:[%s1772_s1 + $0x30] sm:$0xff] (!%p239_p2)  ;;  %v305_v18 = vld [vmem:[%s1772_s1 + $0x38] sm:$0xff] (!%p239_p2)  ;;  %v1354_v20 = vpack.c.bf16 (!%p239_p2), %v528_v16, %v527_v15  ;;  %v531_v25 = vld [vmem:[%s1774_s3 + $0x40] sm:$0xff] (!%p239_p2) }
   0xa   : > { %1335 = vmatprep.subr.bf16.mxu0 (!%p239_p2), %v1334_v5  ;;  %1347 = vmatprep.subr.bf16.mxu1 (!%p239_p2), %v1346_v12  ;;  %v1342_v21 = vpack.c.bf16 (!%p239_p2), %v305_v18, %v304_v17  ;;  %v529_v22 = vld [vmem:[%s1774_s3 + $0x30] sm:$0xff] (!%p239_p2)  ;;  %v530_v23 = vld [vmem:[%s1774_s3 + $0x38] sm:$0xff] (!%p239_p2)  ;;  %v532_v26 = vld [vmem:[%s1774_s3 + $0x48] sm:$0xff] (!%p239_p2) }
   0xb   : > { %1349 = vmatpush3.bf16.msra.mxu1 (!%p239_p2), %v1346_v12  ;;  %v1358_v24 = vpack.c.bf16 (!%p239_p2), %v530_v23, %v529_v22  ;;  %v1362_v28 = vpack.c.bf16 (!%p239_p2), %v532_v26, %v531_v25  ;;  %v533_v30 = vld [vmem:[%s1774_s3 + $0x50] sm:$0xff] (!%p239_p2)  ;;  %v534_v31 = vld [vmem:[%s1774_s3 + $0x58] sm:$0xff] (!%p239_p2)  ;;  %v535_v35 = vld [vmem:[%s1774_s3 + $0x60] sm:$0xff] (!%p239_p2) }
   0xc   : > { %1351 = vmatprep.subr.bf16.mxu1 (!%p239_p2), %v1350_v14  ;;  %v1366_v33 = vpack.c.bf16 (!%p239_p2), %v534_v31, %v533_v30  ;;  %v536_v36 = vld [vmem:[%s1774_s3 + $0x68] sm:$0xff] (!%p239_p2)  ;;  %v537_v49 = vld [vmem:[%s1774_s3 + $0x70] sm:$0xff] (!%p239_p2)  ;;  %v538_v50 = vld [vmem:[%s1774_s3 + $0x78] sm:$0xff] (!%p239_p2) }
   0xd   : > { %s1780_s9 = smov (!%p271_p3, %s1073_s9), 31  ;;  %1337 = vmatpush3.bf16.msra.mxu0 %v1334_v5  ;;  %v1370_v38 = vpack.c.bf16 %v536_v36, %v535_v35  ;;  %v1374_v51 = vpack.c.bf16 %v538_v50, %v537_v49  ;;  %v691_v52 = vld [vmem:[%s1776_s5] sm:$0xff]  ;;  %v692_v53 = vld [vmem:[%s1776_s5 + $0x8] sm:$0xff]  ;;  %v693_v54 = vld [vmem:[%s1776_s5 + $0x10] sm:$0xff] }
   0xe   : > { %s1074_s25 = sshll.u32 %s1780_s9, 3  ;;  %1339 = vmatprep.subr.bf16.mxu0 %v1338_v13  ;;  %v1378_v55 = vpack.c.bf16 %v692_v53, %v691_v52  ;;  %v694_v56 = vld [vmem:[%s1776_s5 + $0x18] sm:$0xff]  ;;  %v695_v58 = vld [vmem:[%s1776_s5 + $0x20] sm:$0xff]  ;;  %v696_v59 = vld [vmem:[%s1776_s5 + $0x28] sm:$0xff] }
   0xf   : > { %s1580_s14 = scalar_lea.vmem %s1771_s0, %s1074_s25  ;;  %1353 = vmatpush3.bf16.msra.mxu1 %v1350_v14  ;;  %v1382_v57 = vpack.c.bf16 %v694_v56, %v693_v54  ;;  %v1386_v60 = vpack.c.bf16 %v696_v59, %v695_v58  ;;  %v1665_v61 = vld [vmem:[%s1773_s2] ss:$0 sm:$0xff] }
  0x10   : > { %v282_v19 = vld [vmem:[%s1580_s14] sm:$0xff]  ;;  %1355 = vmatprep.subr.bf16.mxu1 %v1354_v20  ;;  %v283_v27 = vld [vmem:[%s1580_s14 + $0x8] sm:$0xff]  ;;  %v284_v29 = vld [vmem:[%s1580_s14 + $0x10] sm:$0xff] }
  0x11   : > { %1210 = vmatprep.mubr.msk.f32.mxu0 %vm313_vm0, %v282_v19  ;;  %1341 = vmatpush3.bf16.msra.mxu0 %v1338_v13  ;;  %v285_v32 = vld [vmem:[%s1580_s14 + $0x18] sm:$0xff]  ;;  %v286_v34 = vld [vmem:[%s1580_s14 + $0x20] sm:$0xff]  ;;  %v287_v37 = vld [vmem:[%s1580_s14 + $0x28] sm:$0xff] }
  0x12   : > { %1343 = vmatprep.subr.bf16.mxu0 %v1342_v21  ;;  %v288_v39 = vld [vmem:[%s1580_s14 + $0x30] sm:$0xff]  ;;  %v289_v40 = vld [vmem:[%s1580_s14 + $0x38] sm:$0xff]  ;;  %v290_v41 = vld [vmem:[%s1580_s14 + $0x40] sm:$0xff] }
  0x13   : > { %1357 = vmatpush3.bf16.msra.mxu1 %v1354_v20  ;;  %v291_v42 = vld [vmem:[%s1580_s14 + $0x48] sm:$0xff]  ;;  %v292_v43 = vld [vmem:[%s1580_s14 + $0x50] sm:$0xff]  ;;  %v293_v44 = vld [vmem:[%s1580_s14 + $0x58] sm:$0xff] }
  0x14   : > { %1359 = vmatprep.subr.bf16.mxu1 %v1358_v24  ;;  %v294_v45 = vld [vmem:[%s1580_s14 + $0x60] sm:$0xff]  ;;  %v295_v46 = vld [vmem:[%s1580_s14 + $0x68] sm:$0xff]  ;;  %v296_v47 = vld [vmem:[%s1580_s14 + $0x70] sm:$0xff] }
  0x15   : > { %1345 = vmatpush3.bf16.msra.mxu0 %v1342_v21  ;;  %v297_v48 = vld [vmem:[%s1580_s14 + $0x78] sm:$0xff]  ;;  %v1094_v49 = vld [vmem:[%s1775_s4] ss:$0 sm:$0xff]  ;;  %s1732_s14 = scalar_lea.vmem %s1778_s7, %s1074_s25 }
  0x16   : > { %1379 = vmatprep.subr.bf16.mxu0 %v1378_v55 }
  0x17   : > { %1361 = vmatpush3.bf16.msra.mxu1 %v1358_v24 }
  0x18   : > { %1211 = vmatmul.mubr.msk.f32.vlgmr.msra.gmra.mrb[0].mxu0 %vm313_vm0, %v283_v27  ;;  %1363 = vmatprep.subr.bf16.mxu1 %v1362_v28 }
  0x19   : > { %1213 = vmatprep.mubr.msk.f32.mxu0 %vm313_vm0, %v284_v29  ;;  %1381 = vmatpush3.bf16.msra.mxu0 %v1378_v55 }
  0x1a   : > { %1383 = vmatprep.subr.bf16.mxu0 %v1382_v57 }
  0x1b   : > { %1365 = vmatpush3.bf16.msra.mxu1 %v1362_v28 }
  0x1c   : > { %1214 = vmatmul.mubr.msk.f32.gmra.mrb[2].mxu0 %vm313_vm0, %v285_v32  ;;  %1367 = vmatprep.subr.bf16.mxu1 %v1366_v33 }
  0x1d   : > { %1216 = vmatprep.mubr.msk.f32.mxu0 %vm313_vm0, %v286_v34  ;;  %1385 = vmatpush3.bf16.msra.mxu0 %v1382_v57 }
  0x1e   : > { %1387 = vmatprep.subr.bf16.mxu0 %v1386_v60 }
  0x1f   : > { %1369 = vmatpush3.bf16.msra.mxu1 %v1366_v33 }
  0x20   : > { %1217 = vmatmul.mubr.msk.f32.gmra.mrb[4].mxu0 %vm313_vm0, %v287_v37  ;;  %1371 = vmatprep.subr.bf16.mxu1 %v1370_v38 }
  0x21   : > { %1219 = vmatprep.mubr.msk.f32.mxu0 %vm313_vm0, %v288_v39  ;;  %1389 = vmatpush3.bf16.msra.mxu0 %v1386_v60 }
  0x23   : > { %1373 = vmatpush3.bf16.msra.mxu1 %v1370_v38 }
  0x24   : > { %1220 = vmatmul.mubr.msk.f32.gmra.mrb[6].mxu0 %vm313_vm0, %v289_v40  ;;  %1375 = vmatprep.subr.bf16.mxu1 %v1374_v51 }
  0x25   : > { %1222 = vmatprep.mubr.msk.f32.mxu0 %vm313_vm0, %v290_v41 }
  0x27   : > { %1377 = vmatpush3.bf16.msra.mxu1 %v1374_v51 }
  0x28   : > { %1223 = vmatmul.mubr.msk.f32.gmra.mrb[8].mxu0 %vm313_vm0, %v291_v42  ;;  %1394 = vmatprep.subr.bf16.mxu1 %v1378_v55 }
  0x29   : > { %1225 = vmatprep.mubr.msk.f32.mxu0 %vm313_vm0, %v292_v43 }
  0x2c   : > { %1226 = vmatmul.mubr.msk.f32.gmra.mrb[10].mxu0 %vm313_vm0, %v293_v44 }
  0x2d   : > { %1228 = vmatprep.mubr.msk.f32.mxu0 %vm313_vm0, %v294_v45 }
  0x30   : > { %1229 = vmatmul.mubr.msk.f32.gmra.mrb[12].mxu0 %vm313_vm0, %v295_v46  ;;  %v697_v46 = vld [vmem:[%s1776_s5 + $0x30] sm:$0xff] }
  0x31   : > { %1231 = vmatprep.mubr.msk.f32.mxu0 %vm313_vm0, %v296_v47  ;;  %v698_v47 = vld [vmem:[%s1776_s5 + $0x38] sm:$0xff] }
  0x34   : > { %1232 = vmatmul.mubr.msk.f32.gmra.mrb[14].mxu0 %vm313_vm0, %v297_v48  ;;  %v1390_v48 = vpack.c.bf16 %v698_v47, %v697_v46 }
  0x36   : > { %1391 = vmatprep.subr.bf16.mxu0 %v1390_v48 }
  0x37   : > { %1393 = vmatpush3.bf16.msra.mxu0 %v1390_v48 }
  0xeb   : > { %v1212_v62 = vpop.f32.mrb[0].mxu0 }
  0xec   : > { %v434_v63 = vadd.f32 %v1212_v62, %v1665_v61  ;;  %v428_v0 = vpop.f32.mrb[1].mxu0 }
  0xed   : > { %v429_v1 = vadd.f32 %v1665_v61, %v428_v0 }
  0xee   : > { %v508_v4 = vmax.f32 %v434_v63, 0.0 }
  0xef   : > { %v1215_v2 = vpop.f32.mrb[2].mxu0  ;;  %v507_v3 = vmax.f32 %v429_v1, 0.0 }
  0xf0   : > { %v444_v5 = vadd.f32 %v1215_v2, %v1665_v61  ;;  %v438_v6 = vpop.f32.mrb[3].mxu0 }
  0xf1   : > { %v439_v7 = vadd.f32 %v1665_v61, %v438_v6  ;;  %1266 = vmatprep.mubr.f32.mxu1 %v507_v3 }
  0xf2   : > { %1267 = vmatmul.mubr.f32.vlgmr.msra.gmra.mrb[0].mxu1 %v508_v4  ;;  %v510_v10 = vmax.f32 %v444_v5, 0.0 }
  0xf3   : > { %v509_v8 = vmax.f32 %v439_v7, 0.0  ;;  %v1218_v9 = vpop.f32.mrb[4].mxu0  ;;  %1398 = vmatpush3.bf16.msra.mxu1 %v1378_v55 }
  0xf4   : > { %v454_v11 = vadd.f32 %v1218_v9, %v1665_v61  ;;  %v448_v12 = vpop.f32.mrb[5].mxu0  ;;  %1395 = vmatprep.subr.bf16.mxu1 %v1382_v57 }
  0xf5   : > { %v449_v13 = vadd.f32 %v1665_v61, %v448_v12  ;;  %1269 = vmatprep.mubr.f32.mxu1 %v509_v8 }
  0xf6   : > { %1270 = vmatmul.mubr.f32.gmra.mrb[2].mxu1 %v510_v10  ;;  %v512_v16 = vmax.f32 %v454_v11, 0.0 }
  0xf7   : > { %v511_v14 = vmax.f32 %v449_v13, 0.0  ;;  %v1221_v15 = vpop.f32.mrb[6].mxu0  ;;  %1399 = vmatpush3.bf16.msra.mxu1 %v1382_v57 }
  0xf8   : > { %v464_v17 = vadd.f32 %v1221_v15, %v1665_v61  ;;  %v458_v18 = vpop.f32.mrb[7].mxu0  ;;  %1396 = vmatprep.subr.bf16.mxu1 %v1386_v60 }
  0xf9   : > { %v459_v19 = vadd.f32 %v1665_v61, %v458_v18  ;;  %1272 = vmatprep.mubr.f32.mxu1 %v511_v14  ;;  %v1711_v18 = vld [vmem:[%s1777_s6] ss:$0 sm:$0xff] }
  0xfa   : > { %1273 = vmatmul.mubr.f32.gmra.mrb[4].mxu1 %v512_v16  ;;  %v514_v22 = vmax.f32 %v464_v17, 0.0 }
  0xfb   : > { %v513_v20 = vmax.f32 %v459_v19, 0.0  ;;  %v1224_v21 = vpop.f32.mrb[8].mxu0  ;;  %1400 = vmatpush3.bf16.msra.mxu1 %v1386_v60 }
  0xfc   : > { %v474_v23 = vadd.f32 %v1224_v21, %v1665_v61  ;;  %v468_v24 = vpop.f32.mrb[9].mxu0  ;;  %1397 = vmatprep.subr.bf16.mxu1 %v1390_v48 }
  0xfd   : > { %v469_v25 = vadd.f32 %v1665_v61, %v468_v24  ;;  %1275 = vmatprep.mubr.f32.mxu1 %v513_v20 }
  0xfe   : > { %1276 = vmatmul.mubr.f32.gmra.mrb[6].mxu1 %v514_v22  ;;  %v516_v28 = vmax.f32 %v474_v23, 0.0 }
  0xff   : > { %v515_v26 = vmax.f32 %v469_v25, 0.0  ;;  %v1227_v27 = vpop.f32.mrb[10].mxu0  ;;  %1401 = vmatpush3.bf16.msra.mxu1 %v1390_v48 }
 0x100   : > { %v484_v29 = vadd.f32 %v1227_v27, %v1665_v61  ;;  %v478_v30 = vpop.f32.mrb[11].mxu0 }
 0x101   : > { %v479_v31 = vadd.f32 %v1665_v61, %v478_v30  ;;  %1278 = vmatprep.mubr.f32.mxu1 %v515_v26 }
 0x102   : > { %1279 = vmatmul.mubr.f32.gmra.mrb[8].mxu1 %v516_v28  ;;  %v518_v34 = vmax.f32 %v484_v29, 0.0 }
 0x103   : > { %v517_v32 = vmax.f32 %v479_v31, 0.0  ;;  %v1230_v33 = vpop.f32.mrb[12].mxu0 }
 0x104   : > { %v494_v35 = vadd.f32 %v1230_v33, %v1665_v61  ;;  %v488_v36 = vpop.f32.mrb[13].mxu0 }
 0x105   : > { %v489_v37 = vadd.f32 %v1665_v61, %v488_v36  ;;  %1281 = vmatprep.mubr.f32.mxu1 %v517_v32 }
 0x106   : > { %1282 = vmatmul.mubr.f32.gmra.mrb[10].mxu1 %v518_v34  ;;  %v520_v40 = vmax.f32 %v494_v35, 0.0 }
 0x107   : > { %v519_v38 = vmax.f32 %v489_v37, 0.0  ;;  %v1233_v39 = vpop.f32.mrb[14].mxu0 }
 0x108   : > { %v504_v41 = vadd.f32 %v1233_v39, %v1665_v61  ;;  %v498_v42 = vpop.f32.mrb[15].mxu0 }
 0x109   : > { %v499_v43 = vadd.f32 %v1665_v61, %v498_v42  ;;  %1284 = vmatprep.mubr.f32.mxu1 %v519_v38 }
 0x10a   : > { %1285 = vmatmul.mubr.f32.gmra.mrb[12].mxu1 %v520_v40  ;;  %v522_v45 = vmax.f32 %v504_v41, 0.0 }
 0x10b   : > { %v521_v44 = vmax.f32 %v499_v43, 0.0 }
 0x10d   : > { %1287 = vmatprep.mubr.f32.mxu1 %v521_v44 }
 0x10e   : > { %1288 = vmatmul.mubr.f32.gmra.mrb[14].mxu1 %v522_v45 }
 0x1c5   : > { %v1268_v50 = vpop.f32.mrb[0].mxu1 }
 0x1c6   : > { %v612_v51 = vpop.f32.mrb[1].mxu1  ;;  %v618_v53 = vadd.f32 %v1268_v50, %v1094_v49 }
 0x1c7   : > { %v613_v52 = vadd.f32 %v1094_v49, %v612_v51 }
 0x1c9   : > { %v1271_v54 = vpop.f32.mrb[2].mxu1  ;;  %1306 = vmatprep.mubr.msk.f32.mxu0 %vm313_vm0, %v613_v52 }
 0x1ca   : > { %v622_v55 = vpop.f32.mrb[3].mxu1  ;;  %1307 = vmatmul.mubr.msk.f32.vlgmr.msra.gmra.mrb[16].mxu0 %vm313_vm0, %v618_v53  ;;  %v628_v57 = vadd.f32 %v1271_v54, %v1094_v49 }
 0x1cb   : > { %v623_v56 = vadd.f32 %v1094_v49, %v622_v55 }
 0x1cd   : > { %v1274_v58 = vpop.f32.mrb[4].mxu1  ;;  %1309 = vmatprep.mubr.msk.f32.mxu0 %vm313_vm0, %v623_v56 }
 0x1ce   : > { %v632_v59 = vpop.f32.mrb[5].mxu1  ;;  %1310 = vmatmul.mubr.msk.f32.gmra.mrb[18].mxu0 %vm313_vm0, %v628_v57  ;;  %v638_v61 = vadd.f32 %v1274_v58, %v1094_v49 }
 0x1cf   : > { %v633_v60 = vadd.f32 %v1094_v49, %v632_v59 }
 0x1d1   : > { %v1277_v62 = vpop.f32.mrb[6].mxu1  ;;  %1312 = vmatprep.mubr.msk.f32.mxu0 %vm313_vm0, %v633_v60 }
 0x1d2   : > { %v642_v63 = vpop.f32.mrb[7].mxu1  ;;  %1313 = vmatmul.mubr.msk.f32.gmra.mrb[20].mxu0 %vm313_vm0, %v638_v61  ;;  %v648_v1 = vadd.f32 %v1277_v62, %v1094_v49 }
 0x1d3   : > { %v643_v0 = vadd.f32 %v1094_v49, %v642_v63 }
 0x1d5   : > { %v1280_v2 = vpop.f32.mrb[8].mxu1  ;;  %1315 = vmatprep.mubr.msk.f32.mxu0 %vm313_vm0, %v643_v0 }
 0x1d6   : > { %v652_v3 = vpop.f32.mrb[9].mxu1  ;;  %1316 = vmatmul.mubr.msk.f32.gmra.mrb[22].mxu0 %vm313_vm0, %v648_v1  ;;  %v658_v5 = vadd.f32 %v1280_v2, %v1094_v49 }
 0x1d7   : > { %v653_v4 = vadd.f32 %v1094_v49, %v652_v3 }
 0x1d9   : > { %v1283_v6 = vpop.f32.mrb[10].mxu1  ;;  %1318 = vmatprep.mubr.msk.f32.mxu0 %vm313_vm0, %v653_v4 }
 0x1da   : > { %v662_v7 = vpop.f32.mrb[11].mxu1  ;;  %1319 = vmatmul.mubr.msk.f32.gmra.mrb[24].mxu0 %vm313_vm0, %v658_v5  ;;  %v668_v9 = vadd.f32 %v1283_v6, %v1094_v49 }
 0x1db   : > { %v663_v8 = vadd.f32 %v1094_v49, %v662_v7 }
 0x1dd   : > { %v1286_v10 = vpop.f32.mrb[12].mxu1  ;;  %1321 = vmatprep.mubr.msk.f32.mxu0 %vm313_vm0, %v663_v8 }
 0x1de   : > { %v672_v11 = vpop.f32.mrb[13].mxu1  ;;  %1322 = vmatmul.mubr.msk.f32.gmra.mrb[26].mxu0 %vm313_vm0, %v668_v9  ;;  %v678_v13 = vadd.f32 %v1286_v10, %v1094_v49 }
 0x1df   : > { %v673_v12 = vadd.f32 %v1094_v49, %v672_v11 }
 0x1e1   : > { %v1289_v14 = vpop.f32.mrb[14].mxu1  ;;  %1324 = vmatprep.mubr.msk.f32.mxu1 %vm313_vm0, %v673_v12 }
 0x1e2   : > { %v682_v15 = vpop.f32.mrb[15].mxu1  ;;  %1325 = vmatmul.mubr.msk.f32.vlgmr.msra.gmra.mrb[16].mxu1 %vm313_vm0, %v678_v13  ;;  %v688_v17 = vadd.f32 %v1289_v14, %v1094_v49 }
 0x1e3   : > { %v683_v16 = vadd.f32 %v1094_v49, %v682_v15 }
 0x1e5   : > { %1327 = vmatprep.mubr.msk.f32.mxu1 %vm313_vm0, %v683_v16 }
 0x1e6   : > { %1328 = vmatmul.mubr.msk.f32.gmra.mrb[18].mxu1 %vm313_vm0, %v688_v17 }
 0x29d   : > { %v1308_v19 = vpop.f32.mrb[16].mxu0 }
 0x29e   : > { %v826_v20 = vadd.f32 %v1308_v19, %v1711_v18  ;;  %v820_v21 = vpop.f32.mrb[17].mxu0 }
 0x29f   : > { %v821_v22 = vadd.f32 %v1711_v18, %v820_v21 }
 0x2a0   : > { %v900_v23 = vsub.f32 0.0, %v826_v20 }
 0x2a1   : > { %v899_v24 = vsub.f32 0.0, %v821_v22  ;;  %v1311_v25 = vpop.f32.mrb[18].mxu0 }
 0x2a2   : > { %v917_v26 = vmul.f32 1.442695, %v900_v23  ;;  %v836_v27 = vadd.f32 %v1311_v25, %v1711_v18  ;;  %v830_v28 = vpop.f32.mrb[19].mxu0 }
 0x2a3   : > { %v915_v29 = vmul.f32 1.442695, %v899_v24  ;;  %v831_v30 = vadd.f32 %v1711_v18, %v830_v28 }
 0x2a4   : > { %1410 = vpow2.f32 %v917_v26  ;;  %v902_v31 = vsub.f32 0.0, %v836_v27 }
 0x2a5   : > { %1412 = vpow2.f32 %v915_v29  ;;  %v901_v32 = vsub.f32 0.0, %v831_v30  ;;  %v1314_v33 = vpop.f32.mrb[20].mxu0 }
 0x2a6   : > { %v921_v34 = vmul.f32 1.442695, %v902_v31  ;;  %v846_v35 = vadd.f32 %v1314_v33, %v1711_v18  ;;  %v840_v36 = vpop.f32.mrb[21].mxu0 }
 0x2a7   : > { %v919_v37 = vmul.f32 1.442695, %v901_v32  ;;  %v841_v38 = vadd.f32 %v1711_v18, %v840_v36 }
 0x2a8   : > { %1414 = vpow2.f32 %v921_v34  ;;  %v904_v39 = vsub.f32 0.0, %v846_v35 }
 0x2a9   : > { %1416 = vpow2.f32 %v919_v37  ;;  %v903_v40 = vsub.f32 0.0, %v841_v38  ;;  %v1317_v41 = vpop.f32.mrb[22].mxu0 }
 0x2aa   : > { %v925_v42 = vmul.f32 1.442695, %v904_v39  ;;  %v856_v43 = vadd.f32 %v1317_v41, %v1711_v18  ;;  %v850_v44 = vpop.f32.mrb[23].mxu0 }
 0x2ab   : > { %v923_v45 = vmul.f32 1.442695, %v903_v40  ;;  %v851_v46 = vadd.f32 %v1711_v18, %v850_v44 }
 0x2ac   : > { %1418 = vpow2.f32 %v925_v42  ;;  %v906_v47 = vsub.f32 0.0, %v856_v43 }
 0x2ad   : > { %1420 = vpow2.f32 %v923_v45  ;;  %v905_v48 = vsub.f32 0.0, %v851_v46  ;;  %v1320_v49 = vpop.f32.mrb[24].mxu0 }
 0x2ae   : > { %v1411_v50 = vpop.eup %1410  ;;  %v929_v51 = vmul.f32 1.442695, %v906_v47  ;;  %v866_v52 = vadd.f32 %v1320_v49, %v1711_v18  ;;  %v860_v53 = vpop.f32.mrb[25].mxu0 }
 0x2af   : > { %v1413_v54 = vpop.eup %1412  ;;  %v948_v55 = vadd.f32 1.0, %v1411_v50  ;;  %v927_v56 = vmul.f32 1.442695, %v905_v48  ;;  %v861_v57 = vadd.f32 %v1711_v18, %v860_v53 }
 0x2b0   : > { %v947_v58 = vadd.f32 1.0, %v1413_v54  ;;  %1422 = vpow2.f32 %v929_v51  ;;  %v908_v59 = vsub.f32 0.0, %v866_v52 }
 0x2b1   : > { %1424 = vrcp.f32 %v948_v55  ;;  %v907_v60 = vsub.f32 0.0, %v861_v57  ;;  %v1323_v61 = vpop.f32.mrb[26].mxu0 }
 0x2b2   : > { %v1415_v62 = vpop.eup %1414  ;;  %1426 = vrcp.f32 %v947_v58  ;;  %v933_v63 = vmul.f32 1.442695, %v908_v59  ;;  %v876_v0 = vadd.f32 %v1323_v61, %v1711_v18  ;;  %v870_v1 = vpop.f32.mrb[27].mxu0 }
 0x2b3   : > { %v1417_v2 = vpop.eup %1416  ;;  %v950_v3 = vadd.f32 1.0, %v1415_v62  ;;  %1428 = vpow2.f32 %v927_v56  ;;  %v931_v4 = vmul.f32 1.442695, %v907_v60  ;;  %v871_v5 = vadd.f32 %v1711_v18, %v870_v1 }
 0x2b4   : > { %v949_v6 = vadd.f32 1.0, %v1417_v2  ;;  %1430 = vpow2.f32 %v933_v63  ;;  %v910_v7 = vsub.f32 0.0, %v876_v0 }
 0x2b5   : > { %1432 = vrcp.f32 %v950_v3  ;;  %v909_v8 = vsub.f32 0.0, %v871_v5  ;;  %v1326_v9 = vpop.f32.mrb[16].mxu1 }
 0x2b6   : > { %v1419_v10 = vpop.eup %1418  ;;  %1434 = vrcp.f32 %v949_v6  ;;  %v937_v11 = vmul.f32 1.442695, %v910_v7  ;;  %v886_v12 = vadd.f32 %v1326_v9, %v1711_v18  ;;  %v880_v13 = vpop.f32.mrb[17].mxu1 }
 0x2b7   : > { %v1421_v14 = vpop.eup %1420  ;;  %v952_v15 = vadd.f32 1.0, %v1419_v10  ;;  %1436 = vpow2.f32 %v931_v4  ;;  %v935_v16 = vmul.f32 1.442695, %v909_v8  ;;  %v881_v17 = vadd.f32 %v1711_v18, %v880_v13 }
 0x2b8   : > { %v951_v19 = vadd.f32 1.0, %v1421_v14  ;;  %1438 = vpow2.f32 %v937_v11  ;;  %v912_v20 = vsub.f32 0.0, %v886_v12 }
 0x2b9   : > { %1440 = vrcp.f32 %v952_v15  ;;  %v911_v21 = vsub.f32 0.0, %v881_v17  ;;  %v1329_v22 = vpop.f32.mrb[18].mxu1 }
 0x2ba   : > { %v1423_v23 = vpop.eup %1422  ;;  %1442 = vrcp.f32 %v951_v19  ;;  %v941_v24 = vmul.f32 1.442695, %v912_v20  ;;  %v896_v25 = vadd.f32 %v1329_v22, %v1711_v18  ;;  %v890_v26 = vpop.f32.mrb[19].mxu1 }
 0x2bb   : > { %v1425_v27 = vpop.eup %1424  ;;  %v954_v28 = vadd.f32 1.0, %v1423_v23  ;;  %1444 = vpow2.f32 %v935_v16  ;;  %v939_v29 = vmul.f32 1.442695, %v911_v21  ;;  %v891_v30 = vadd.f32 %v1711_v18, %v890_v26 }
 0x2bc   : > { %v1427_v31 = vpop.eup %1426  ;;  %997 = vst.msk [vmem:[%s1732_s14 + $0x8] sm:$0xff] %vm995_vm1, %v1425_v27  ;;  %1446 = vpow2.f32 %v941_v24  ;;  %v914_v32 = vsub.f32 0.0, %v896_v25 }
 0x2bd   : > { %v1429_v33 = vpop.eup %1428  ;;  %996 = vst.msk [vmem:[%s1732_s14] sm:$0xff] %vm995_vm1, %v1427_v31  ;;  %1448 = vrcp.f32 %v954_v28  ;;  %v913_v34 = vsub.f32 0.0, %v891_v30 }
 0x2be   : > { %v1431_v35 = vpop.eup %1430  ;;  %v953_v36 = vadd.f32 1.0, %v1429_v33  ;;  %1450 = vpow2.f32 %v939_v29  ;;  %v945_v37 = vmul.f32 1.442695, %v914_v32 }
 0x2bf   : > { %v1433_v38 = vpop.eup %1432  ;;  %v956_v39 = vadd.f32 1.0, %v1431_v35  ;;  %v943_v18 = vmul.f32 1.442695, %v913_v34 }
 0x2c0   : > { %v1435_v40 = vpop.eup %1434  ;;  %999 = vst.msk [vmem:[%s1732_s14 + $0x18] sm:$0xff] %vm995_vm1, %v1433_v38  ;;  %1452 = vrcp.f32 %v953_v36 }
 0x2c1   : > { %v1437_v41 = vpop.eup %1436  ;;  %998 = vst.msk [vmem:[%s1732_s14 + $0x10] sm:$0xff] %vm995_vm1, %v1435_v40  ;;  %1454 = vrcp.f32 %v956_v39 }
 0x2c2   : > { %v1439_v42 = vpop.eup %1438  ;;  %v955_v43 = vadd.f32 1.0, %v1437_v41  ;;  %1456 = vpow2.f32 %v945_v37 }
 0x2c3   : > { %v1441_v44 = vpop.eup %1440  ;;  %v958_v45 = vadd.f32 1.0, %v1439_v42  ;;  %1458 = vpow2.f32 %v943_v18 }
 0x2c4   : > { %v1443_v46 = vpop.eup %1442  ;;  %1001 = vst.msk [vmem:[%s1732_s14 + $0x28] sm:$0xff] %vm995_vm1, %v1441_v44  ;;  %1460 = vrcp.f32 %v955_v43 }
 0x2c5   : > { %v1445_v47 = vpop.eup %1444  ;;  %1000 = vst.msk [vmem:[%s1732_s14 + $0x20] sm:$0xff] %vm995_vm1, %v1443_v46  ;;  %1462 = vrcp.f32 %v958_v45 }
 0x2c6   : > { %v1447_v48 = vpop.eup %1446  ;;  %v957_v49 = vadd.f32 1.0, %v1445_v47 }
 0x2c7   : > { %v1449_v50 = vpop.eup %1448  ;;  %v960_v51 = vadd.f32 1.0, %v1447_v48 }
 0x2c8   : > { %v1451_v52 = vpop.eup %1450  ;;  %1003 = vst.msk [vmem:[%s1732_s14 + $0x38] sm:$0xff] %vm995_vm1, %v1449_v50  ;;  %1464 = vrcp.f32 %v957_v49 }
 0x2c9   : > { %1466 = vrcp.f32 %v960_v51  ;;  %v959_v53 = vadd.f32 1.0, %v1451_v52 }
 0x2ca   : > { %v1453_v54 = vpop.eup %1452 }
 0x2cb   : > { %v1455_v55 = vpop.eup %1454  ;;  %1002 = vst.msk [vmem:[%s1732_s14 + $0x30] sm:$0xff] %vm995_vm1, %v1453_v54  ;;  %1468 = vrcp.f32 %v959_v53 }
 0x2cc   : > { %v1457_v56 = vpop.eup %1456  ;;  %1005 = vst.msk [vmem:[%s1732_s14 + $0x48] sm:$0xff] %vm995_vm1, %v1455_v55 }
 0x2cd   : > { %v1459_v57 = vpop.eup %1458  ;;  %v962_v58 = vadd.f32 1.0, %v1457_v56 }
 0x2ce   : > { %v1461_v59 = vpop.eup %1460  ;;  %v961_v60 = vadd.f32 1.0, %v1459_v57 }
 0x2cf   : > { %v1463_v61 = vpop.eup %1462  ;;  %1004 = vst.msk [vmem:[%s1732_s14 + $0x40] sm:$0xff] %vm995_vm1, %v1461_v59  ;;  %1470 = vrcp.f32 %v962_v58 }
 0x2d0   : > { %1007 = vst.msk [vmem:[%s1732_s14 + $0x58] sm:$0xff] %vm995_vm1, %v1463_v61  ;;  %1472 = vrcp.f32 %v961_v60 }
 0x2d2   : > { %v1465_v62 = vpop.eup %1464 }
 0x2d3   : > { %v1467_v63 = vpop.eup %1466  ;;  %1006 = vst.msk [vmem:[%s1732_s14 + $0x50] sm:$0xff] %vm995_vm1, %v1465_v62 }
 0x2d4   : > { %1009 = vst.msk [vmem:[%s1732_s14 + $0x68] sm:$0xff] %vm995_vm1, %v1467_v63 }
 0x2d5   : > { %v1469_v0 = vpop.eup %1468 }
 0x2d6   : > { %1008 = vst.msk [vmem:[%s1732_s14 + $0x60] sm:$0xff] %vm995_vm1, %v1469_v0 }
 0x2d9   : > { %v1471_v1 = vpop.eup %1470 }
 0x2da   : > { %v1473_v2 = vpop.eup %1472  ;;  %1011 = vst.msk [vmem:[%s1732_s14 + $0x78] sm:$0xff] %vm995_vm1, %v1471_v1 }
 0x2db   : > { %1010 = vst.msk [vmem:[%s1732_s14 + $0x70] sm:$0xff] %vm995_vm1, %v1473_v2 }
 0x2dc PF: > { %s17_s24 = sadd.s32 1, %s1480_s24  }
 0x2dd   : > { %p14_p4 = scmp.ge.s32.totalorder %s17_s24, 4  }
 0x2df   :  { %16 = sbr.rel (!%p14_p4) target bundleno = 1 (0x1), region = 78 }

</bundles_post_ra>
